<compile_context>
chip_gen: v7x
topology: tpu7x:2x2x1
jax: 0.10.0
libtpu: 0.0.40
codegen_flags: <defaults>
</compile_context>

<pallas_src>
import functools
import math

import jax
import jax.numpy as jnp
from jax.experimental import pallas as pl
from jax.experimental.pallas import tpu as pltpu


_MIN_GRID_STEPS = 8  # pipelining + lets ("parallel",) shard across v7x's 2 TensorCores


# --------------------------------------------------------------------------------------
# Kernels
# --------------------------------------------------------------------------------------
def _rmsnorm_kernel(x_ref, w_ref, o_ref, *, eps: float, lowp_scale: bool):
    """Simple path: one logical row per lane-row; normalize over the full last axis."""
    x = x_ref[...]                                   # (block_rows, dim)
    xf = x.astype(jnp.float32)
    inv = jax.lax.rsqrt(jnp.mean(xf * xf, axis=-1, keepdims=True) + eps)   # EUP
    if lowp_scale:
        # bf16/f16-native VPU scaling (v7x); the mean/rsqrt above stays f32.
        o_ref[...] = (x * inv.astype(x.dtype) * w_ref[...]).astype(o_ref.dtype)
    else:
        # Full-f32 elementwise path, single downcast at the end (v5e/v6e, and all f32 inputs).
        o_ref[...] = (xf * inv * w_ref[...]).astype(o_ref.dtype)


def _rmsnorm_packed_kernel(x_ref, w_ref, o_ref, *, eps: float, dim: int, n_seg: int):
    """Packed path for dim < 128: n_seg logical rows per 128-wide lane-row.

    Lane-dense loads/stores to HBM; the per-logical-row mean is a segmented f32 reduce
    over static lane slices (segments never mix logical rows).
    """
    x = x_ref[...]                                   # (block_rows, n_seg * dim)
    xf = x.astype(jnp.float32)
    xx = xf * xf
    w = w_ref[...]                                   # (1, dim) float32, resident
    inv_dim = 1.0 / float(dim)
    for t in range(n_seg):                           # static unroll over packed segments
        sl = slice(t * dim, (t + 1) * dim)
        ms = jnp.sum(xx[:, sl], axis=-1, keepdims=True) * inv_dim
        inv_t = jax.lax.rsqrt(ms + eps)              # (block_rows, 1)
        o_ref[:, sl] = (xf[:, sl] * inv_t * w).astype(o_ref.dtype)


# --------------------------------------------------------------------------------------
# Host-side sizing helpers
# --------------------------------------------------------------------------------------
def _vmem_capacity_bytes() -> int:
    try:
        cap = int(pltpu.get_tpu_info().vmem_capacity_bytes)
        if cap > 0:
            return cap
    except Exception:
        pass
    return 64 << 20            # conservative fallback: assume v7x-sized per-core VMEM


def _vmem_budget(cap: int, itemsize: int) -> tuple[int, int]:
    """Returns (vmem_limit_bytes, target input-DMA bytes per grid step)."""
    if cap >= (100 << 20):     # v5e / v6e: 128 MiB physical VMEM per core
        return 64 << 20, ((6 << 20) if itemsize >= 4 else (4 << 20))
    # v7x: 64 MiB per TensorCore -> keep scoped limit and tiles smaller.
    return min(48 << 20, (cap * 3) // 4), (4 << 20)


def _choose_block_rows(rows: int, row_bytes: int, sublane: int, target_bytes: int) -> int:
    """Rows per block: ~target_bytes of input HBM traffic per step, rounded to the dtype's
    native sublane tile, clamped so the grid keeps a few steps for overlap / megacore."""
    br = max(sublane, (target_bytes // max(row_bytes, 1)) // sublane * sublane)
    rows_up = -(-rows // sublane) * sublane
    if rows_up > _MIN_GRID_STEPS * sublane:          # problem big enough to split
        per_step = -(-rows // _MIN_GRID_STEPS)
        per_step = max(sublane, -(-per_step // sublane) * sublane)
        br = min(br, per_step)
    br = min(br, rows_up)
    if br >= rows:
        br = rows                                    # single full-extent block
    return max(1, br)


# --------------------------------------------------------------------------------------
# Public wrapper
# --------------------------------------------------------------------------------------
def rmsnorm(x: jax.Array, weight: jax.Array | None = None, eps: float = 1e-6,
            block_rows: int | None = None) -> jax.Array:
    """RMSNorm over the last axis of x, matching the PyTorch module's forward."""
    orig_shape = x.shape
    dim = orig_shape[-1]
    dt = jnp.dtype(x.dtype)
    itemsize = dt.itemsize
    if weight is None:                               # elementwise_affine=False path
        weight = jnp.ones((dim,), dtype=jnp.float32)
    weight = jnp.asarray(weight)
    assert weight.shape == (dim,)

    rows = math.prod(orig_shape[:-1]) if len(orig_shape) > 1 else 1

    cap = _vmem_capacity_bytes()
    vmem_limit, target_bytes = _vmem_budget(cap, itemsize)
    # bf16/f16 scale-multiplies only on small-VMEM (v7x) parts, which are bf16-VPU native;
    # v5e (no bf16 VPU) and f32 inputs keep the all-f32 elementwise path.
    lowp_scale = (itemsize == 2 and jnp.issubdtype(dt, jnp.floating)
                  and cap < (100 << 20))

    # Lane packing for small dims -> lane-dense HBM loads/stores (biggest store-path lever).
    n_seg = 1
    if 0 < dim < 128 and 128 % dim == 0:
        k = 128 // dim
        if rows % k == 0 and rows >= k:
            n_seg = k

    width = n_seg * dim
    rows2 = rows // n_seg
    x2 = x.reshape(rows2, width)

    sublane = max(8, 32 // itemsize)                 # 8 f32, 16 bf16/f16, 32 int8/fp8
    if block_rows is None:
        block_rows = _choose_block_rows(rows2, width * itemsize, sublane, target_bytes)

    grid = (pl.cdiv(rows2, block_rows),)

    if n_seg == 1:
        w_dtype = dt if lowp_scale else jnp.float32
        w2 = weight.astype(w_dtype).reshape(1, dim)  # pre-cast host-side: no per-step cast
        kernel = functools.partial(_rmsnorm_kernel, eps=float(eps), lowp_scale=lowp_scale)
    else:
        w2 = weight.astype(jnp.float32).reshape(1, dim)
        kernel = functools.partial(_rmsnorm_packed_kernel, eps=float(eps),
                                   dim=dim, n_seg=n_seg)

    cost = pl.CostEstimate(
        flops=4 * rows * dim,
        transcendentals=rows,
        bytes_accessed=2 * rows * dim * itemsize + dim * int(jnp.dtype(w2.dtype).itemsize),
    )

    out = pl.pallas_call(
        kernel,
        out_shape=jax.ShapeDtypeStruct((rows2, width), x.dtype),
        grid_spec=pltpu.PrefetchScalarGridSpec(
            num_scalar_prefetch=0,
            grid=grid,
            in_specs=[
                pl.BlockSpec((block_rows, width), lambda i: (i, 0)),
                pl.BlockSpec((1, dim), lambda i: (0, 0)),   # constant index -> resident weight
            ],
            out_specs=pl.BlockSpec((block_rows, width), lambda i: (i, 0)),
        ),
        compiler_params=pltpu.CompilerParams(
            dimension_semantics=("parallel",),
            vmem_limit_bytes=int(vmem_limit),
        ),
        cost_estimate=cost,
    )(x2, w2)

    return out.reshape(orig_shape)


# --------------------------------------------------------------------------------------
# Reference + self-test
# --------------------------------------------------------------------------------------
def _ref_rmsnorm(x, weight, eps):
    xf = x.astype(jnp.float32)
    inv = jax.lax.rsqrt(jnp.mean(xf * xf, axis=-1, keepdims=True) + eps)
    return (xf * inv * weight.astype(jnp.float32)).astype(x.dtype)


if __name__ == "__main__":
    eps = 1e-6
    key = jax.random.PRNGKey(0)
    k1, k2, k3, k4, k5, k6 = jax.random.split(key, 6)

    # 1) Module-consistent small shape (batch, seq, dim) with affine init (ones).
    #    dim=32 -> packed lane-dense path (4 logical rows per 128-lane row).
    x1 = jax.random.normal(k1, (2, 8, 32), dtype=jnp.float32)
    w1 = jnp.ones((32,), dtype=jnp.float32)
    out1 = jax.block_until_ready(rmsnorm(x1, w1, eps=eps))
    ref1 = _ref_rmsnorm(x1, w1, eps)
    assert out1.shape == x1.shape and out1.dtype == x1.dtype
    assert jnp.allclose(out1, ref1, atol=1e-5, rtol=1e-5)

    # 2) rows not divisible by the packing factor -> un-packed fallback, non-trivial weight.
    x2 = jax.random.normal(k2, (3, 7, 32), dtype=jnp.float32)
    w2 = jax.random.normal(k3, (32,), dtype=jnp.float32)
    out2 = jax.block_until_ready(rmsnorm(x2, w2, eps=eps))
    assert jnp.allclose(out2, _ref_rmsnorm(x2, w2, eps), atol=1e-5, rtol=1e-5)

    # 3) Lane-dense dim=128, several grid steps, explicit block_rows override.
    x3 = jax.random.normal(k4, (4, 96, 128), dtype=jnp.float32)
    w3 = jax.random.normal(k5, (128,), dtype=jnp.float32) * 0.1 + 1.0
    out3 = jax.block_until_ready(rmsnorm(x3, w3, eps=eps, block_rows=128))
    assert jnp.allclose(out3, _ref_rmsnorm(x3, w3, eps), atol=1e-5, rtol=1e-5)

    # 4) Packed path with multiple grid steps and a masked partial last block.
    x4 = jax.random.normal(k6, (63, 8, 32), dtype=jnp.float32)
    w4 = jax.random.normal(k3, (32,), dtype=jnp.float32)
    out4 = jax.block_until_ready(rmsnorm(x4, w4, eps=eps))
    assert jnp.allclose(out4, _ref_rmsnorm(x4, w4, eps), atol=1e-5, rtol=1e-5)

    # 5) bf16 input: 16-row sublane tiling; low-precision scale path exercised on v7x.
    x5 = jax.random.normal(k2, (2, 64, 256), dtype=jnp.float32).astype(jnp.bfloat16)
    w5 = jax.random.normal(k5, (256,), dtype=jnp.float32) * 0.1 + 1.0
    out5 = jax.block_until_ready(rmsnorm(x5, w5, eps=eps))
    ref5 = _ref_rmsnorm(x5, w5, eps)
    assert out5.dtype == jnp.bfloat16 and out5.shape == x5.shape
    assert jnp.allclose(out5.astype(jnp.float32), ref5.astype(jnp.float32),
                        atol=3e-2, rtol=3e-2)

    print("KERNEL_OK")
</pallas_src>

<mosaic_0001>
module attributes {stable_mosaic.version = 11 : i64} {
  func.func @_rmsnorm_packed_kernel(%arg0: i32, %arg1: memref<4x128xf32, #tpu.memory_space<vmem>>, %arg2: memref<1x32xf32, #tpu.memory_space<vmem>>, %arg3: memref<4x128xf32, #tpu.memory_space<vmem>>) attributes {dimension_semantics = [#tpu.dimension_semantics<parallel>], iteration_bounds = array<i64: 1>, scalar_prefetch = 0 : i64, scratch_operands = 0 : i64, tpu.core_type = #tpu.core_type<tc>, window_params = [{transform_indices = @transform_0, window_bounds = array<i64: 4, 128>}, {pipeline_mode = #tpu.pipeline_mode<synchronous>, transform_indices = @transform_1, window_bounds = array<i64: 1, 32>}, {transform_indices = @transform_2, window_bounds = array<i64: 4, 128>}]} {
    %c0 = arith.constant 0 : index
    %c0_0 = arith.constant 0 : index
    %0 = vector.load %arg1[%c0, %c0_0] : memref<4x128xf32, #tpu.memory_space<vmem>>, vector<4x128xf32>
    %1 = arith.mulf %0, %0 : vector<4x128xf32>
    %c0_1 = arith.constant 0 : index
    %c0_2 = arith.constant 0 : index
    %2 = vector.load %arg2[%c0_1, %c0_2] : memref<1x32xf32, #tpu.memory_space<vmem>>, vector<1x32xf32>
    %3 = vector.extract_strided_slice %1 {offsets = [0, 0], sizes = [4, 32], strides = [1, 1]} : vector<4x128xf32> to vector<4x32xf32>
    %cst = arith.constant dense<0.000000e+00> : vector<4xf32>
    %4 = vector.multi_reduction <add>, %3, %cst [1] : vector<4x32xf32> to vector<4xf32>
    %5 = vector.shape_cast %4 : vector<4xf32> to vector<4x1xf32>
    %cst_3 = arith.constant 3.125000e-02 : f32
    %6 = vector.broadcast %cst_3 : f32 to vector<4x1xf32>
    %7 = arith.mulf %5, %6 : vector<4x1xf32>
    %cst_4 = arith.constant 9.99999997E-7 : f32
    %8 = vector.broadcast %cst_4 : f32 to vector<4x1xf32>
    %9 = arith.addf %7, %8 : vector<4x1xf32>
    %10 = math.rsqrt %9 : vector<4x1xf32>
    %11 = vector.extract_strided_slice %0 {offsets = [0, 0], sizes = [4, 32], strides = [1, 1]} : vector<4x128xf32> to vector<4x32xf32>
    %12 = vector.broadcast %10 : vector<4x1xf32> to vector<4x32xf32>
    %13 = arith.mulf %11, %12 : vector<4x32xf32>
    %14 = vector.broadcast %2 : vector<1x32xf32> to vector<4x32xf32>
    %15 = arith.mulf %13, %14 : vector<4x32xf32>
    %c0_5 = arith.constant 0 : index
    %c0_6 = arith.constant 0 : index
    %16 = vector.load %arg3[%c0_5, %c0_6] : memref<4x128xf32, #tpu.memory_space<vmem>>, vector<4x32xf32>
    tpu.vector_store %arg3[%c0_5, %c0_6], %15 {strides = array<i32>} : memref<4x128xf32, #tpu.memory_space<vmem>>, vector<4x32xf32>,
    %17 = vector.extract_strided_slice %1 {offsets = [0, 32], sizes = [4, 32], strides = [1, 1]} : vector<4x128xf32> to vector<4x32xf32>
    %cst_7 = arith.constant dense<0.000000e+00> : vector<4xf32>
    %18 = vector.multi_reduction <add>, %17, %cst_7 [1] : vector<4x32xf32> to vector<4xf32>
    %19 = vector.shape_cast %18 : vector<4xf32> to vector<4x1xf32>
    %cst_8 = arith.constant 3.125000e-02 : f32
    %20 = vector.broadcast %cst_8 : f32 to vector<4x1xf32>
    %21 = arith.mulf %19, %20 : vector<4x1xf32>
    %cst_9 = arith.constant 9.99999997E-7 : f32
    %22 = vector.broadcast %cst_9 : f32 to vector<4x1xf32>
    %23 = arith.addf %21, %22 : vector<4x1xf32>
    %24 = math.rsqrt %23 : vector<4x1xf32>
    %25 = vector.extract_strided_slice %0 {offsets = [0, 32], sizes = [4, 32], strides = [1, 1]} : vector<4x128xf32> to vector<4x32xf32>
    %26 = vector.broadcast %24 : vector<4x1xf32> to vector<4x32xf32>
    %27 = arith.mulf %25, %26 : vector<4x32xf32>
    %28 = vector.broadcast %2 : vector<1x32xf32> to vector<4x32xf32>
    %29 = arith.mulf %27, %28 : vector<4x32xf32>
    %c0_10 = arith.constant 0 : index
    %c32 = arith.constant 32 : index
    %30 = vector.load %arg3[%c0_10, %c32] : memref<4x128xf32, #tpu.memory_space<vmem>>, vector<4x32xf32>
    tpu.vector_store %arg3[%c0_10, %c32], %29 {strides = array<i32>} : memref<4x128xf32, #tpu.memory_space<vmem>>, vector<4x32xf32>,
    %31 = vector.extract_strided_slice %1 {offsets = [0, 64], sizes = [4, 32], strides = [1, 1]} : vector<4x128xf32> to vector<4x32xf32>
    %cst_11 = arith.constant dense<0.000000e+00> : vector<4xf32>
    %32 = vector.multi_reduction <add>, %31, %cst_11 [1] : vector<4x32xf32> to vector<4xf32>
    %33 = vector.shape_cast %32 : vector<4xf32> to vector<4x1xf32>
    %cst_12 = arith.constant 3.125000e-02 : f32
    %34 = vector.broadcast %cst_12 : f32 to vector<4x1xf32>
    %35 = arith.mulf %33, %34 : vector<4x1xf32>
    %cst_13 = arith.constant 9.99999997E-7 : f32
    %36 = vector.broadcast %cst_13 : f32 to vector<4x1xf32>
    %37 = arith.addf %35, %36 : vector<4x1xf32>
    %38 = math.rsqrt %37 : vector<4x1xf32>
    %39 = vector.extract_strided_slice %0 {offsets = [0, 64], sizes = [4, 32], strides = [1, 1]} : vector<4x128xf32> to vector<4x32xf32>
    %40 = vector.broadcast %38 : vector<4x1xf32> to vector<4x32xf32>
    %41 = arith.mulf %39, %40 : vector<4x32xf32>
    %42 = vector.broadcast %2 : vector<1x32xf32> to vector<4x32xf32>
    %43 = arith.mulf %41, %42 : vector<4x32xf32>
    %c0_14 = arith.constant 0 : index
    %c64 = arith.constant 64 : index
    %44 = vector.load %arg3[%c0_14, %c64] : memref<4x128xf32, #tpu.memory_space<vmem>>, vector<4x32xf32>
    tpu.vector_store %arg3[%c0_14, %c64], %43 {strides = array<i32>} : memref<4x128xf32, #tpu.memory_space<vmem>>, vector<4x32xf32>,
    %45 = vector.extract_strided_slice %1 {offsets = [0, 96], sizes = [4, 32], strides = [1, 1]} : vector<4x128xf32> to vector<4x32xf32>
    %cst_15 = arith.constant dense<0.000000e+00> : vector<4xf32>
    %46 = vector.multi_reduction <add>, %45, %cst_15 [1] : vector<4x32xf32> to vector<4xf32>
    %47 = vector.shape_cast %46 : vector<4xf32> to vector<4x1xf32>
    %cst_16 = arith.constant 3.125000e-02 : f32
    %48 = vector.broadcast %cst_16 : f32 to vector<4x1xf32>
    %49 = arith.mulf %47, %48 : vector<4x1xf32>
    %cst_17 = arith.constant 9.99999997E-7 : f32
    %50 = vector.broadcast %cst_17 : f32 to vector<4x1xf32>
    %51 = arith.addf %49, %50 : vector<4x1xf32>
    %52 = math.rsqrt %51 : vector<4x1xf32>
    %53 = vector.extract_strided_slice %0 {offsets = [0, 96], sizes = [4, 32], strides = [1, 1]} : vector<4x128xf32> to vector<4x32xf32>
    %54 = vector.broadcast %52 : vector<4x1xf32> to vector<4x32xf32>
    %55 = arith.mulf %53, %54 : vector<4x32xf32>
    %56 = vector.broadcast %2 : vector<1x32xf32> to vector<4x32xf32>
    %57 = arith.mulf %55, %56 : vector<4x32xf32>
    %c0_18 = arith.constant 0 : index
    %c96 = arith.constant 96 : index
    %58 = vector.load %arg3[%c0_18, %c96] : memref<4x128xf32, #tpu.memory_space<vmem>>, vector<4x32xf32>
    tpu.vector_store %arg3[%c0_18, %c96], %57 {strides = array<i32>} : memref<4x128xf32, #tpu.memory_space<vmem>>, vector<4x32xf32>,
    return
  }
  func.func @transform_0(%arg0: i32) -> (i32, i32) {
    %c0_i32 = arith.constant 0 : i32
    %c0_i32_0 = arith.constant 0 : i32
    return %arg0, %c0_i32 : i32, i32
  }
  func.func @transform_1(%arg0: i32) -> (i32, i32) {
    %c0_i32 = arith.constant 0 : i32
    %c0_i32_0 = arith.constant 0 : i32
    %c0_i32_1 = arith.constant 0 : i32
    return %c0_i32, %c0_i32_0 : i32, i32
  }
  func.func @transform_2(%arg0: i32) -> (i32, i32) {
    %c0_i32 = arith.constant 0 : i32
    %c0_i32_0 = arith.constant 0 : i32
    return %arg0, %c0_i32 : i32, i32
  }
}

</mosaic_0001>

<bundles_post_ra>
// kernel: tpu_custom_call.1
= control target key start
LH: loop header
LB: loop body
LE: loop exit
PB: predicated region body
PF: predicated region fallthrough
CT: control target
= control target key end

     0   :  { %7 = vsyncpa [#allocation3], 0  ;;  %s221_s0 = inlined_call_operand.hbm [shape: f32[4,128], index: 0, kind: input, shape index: {}]   ;;  %s222_s1 = inlined_call_operand.vmem [shape: f32[1,32], index: 1, kind: input, shape index: {}]   ;;  %s223_s2 = inlined_call_operand.hbm [shape: f32[4,128], index: 2, kind: output, shape index: {}]  }
   0x1   :  { %8 = vsyncpa [#allocation4], 0  ;;  %s169_s9 = smov [#allocation2]   ;;  %s121_s13 = scalar_lea.hbm %s221_s0, 64 }
   0x2   :  { %s15_s10 = sshll.u32 %s169_s9, 4  ;;  %p122_p0 = scmp.ne.s32.totalorder %s221_s0, %s121_s13  ;;  %s16_s10 = int_to_ptr.vmem [resolvable:$true] %s15_s10 }
   0x3   :  { %p125_p1 = scmp.lt.u32.totalorder %s121_s13, %s221_s0 }
   0x5   :  { %p127_p2 = pnand %p125_p1, %p122_p0 }
   0x7   :  { %130 = shalt.err (!%p127_p2)
}
   0x8   :  { %s131_s18 = scalar_lea.vmem %s16_s10, 64  ;;  %p136_p4 = scmp.lt.s32.totalorder %s16_s10, %s16_s10 }
   0x9   :  { %p132_p3 = scmp.ne.s32.totalorder %s16_s10, %s131_s18  ;;  %p137_p5 = scmp.lt.s32.totalorder %s131_s18, %s131_s18 }
   0xb   :  { %p138_p6 = por %p137_p5, %p136_p4 }
   0xd   :  { %p139_p7 = pnand %p138_p6, %p132_p3 }
   0xf   :  { %142 = shalt.err (!%p139_p7)
}
  0x10   :  { %18 = dma.hbm_to_vmem [thread:$0]  %s221_s0, 64, %s16_s10, [#allocation3]  }
  0x11   :  { %165 = dma.done.wait [#allocation3], 64  }
  0x12   :  { %166 = vsyncadd [#allocation3], 4294967232  ;;  %v24_v0 = vld [vmem:[#allocation2] sm:$0xf]  ;;  %s170_s21 = smov 96   ;;  %s171_s22 = smov 32  }
  0x13   :  { %v25_v1 = vmul.f32 %v24_v0, %v24_v0  ;;  %s172_s23 = smov 64   ;;  %vm27_vm0 = vcmask 257024   ;;  %v107_v3 = vld [vmem:[%s222_s1] ss:$0 sm:$0xff]  ;;  %vm58_vm1 = vcmask 519424   ;;  %s173_s0 = smov [#allocation5]  }
  0x14   :  { %s98_s1 = sshll.u32 %s173_s0, 4  ;;  %vm74_vm2 = vcmask 781824   ;;  %vm90_vm3 = vcmask 1044224   ;;  %s99_s1 = int_to_ptr.vmem [resolvable:$true] %s98_s1 }
  0x15   :  { %44 = vrot.lane.b32.xlu0 %v25_v1, %s170_s21  ;;  %76 = vrot.lane.b32.xlu1 %v25_v1, %s171_s22  ;;  %v28_v2 = vsel %vm27_vm0, %v25_v1, 0.0  ;;  %s143_s26 = scalar_lea.vmem %s99_s1, 64  ;;  %p148_p9 = scmp.lt.s32.totalorder %s99_s1, %s99_s1 }
  0x16   :  { %p144_p8 = scmp.ne.s32.totalorder %s99_s1, %s143_s26  ;;  %p149_p10 = scmp.lt.s32.totalorder %s143_s26, %s143_s26 }
  0x18   :  { %p150_p11 = por %p149_p10, %p148_p9 }
  0x19   :  { %60 = vrot.lane.b32.xlu0 %v25_v1, %s172_s23 }
  0x1a   :  { %p151_p12 = pnand %p150_p11, %p144_p8 }
  0x39   :  { %29 = vadd.xlane.f32.xlu1 %v28_v2 }
  0x4a   :  { %70 = vrot.lane.b32.xlu1 %v107_v3, %s172_s23 }
  0x87   :  { %v45_v4 = vpop.permute.xlu0 %44  ;;  %v77_v5 = vpop.permute.xlu1 %76 }
  0x88   :  { %v47_v6 = vsel %vm27_vm0, %v45_v4, 0.0  ;;  %v79_v7 = vsel %vm27_vm0, %v77_v5, 0.0 }
  0x89   :  { %48 = vadd.xlane.f32.xlu0 %v47_v6  ;;  %80 = vadd.xlane.f32.xlu1 %v79_v7 }
  0x8b   :  { %v61_v8 = vpop.permute.xlu0 %60 }
  0x8c   :  { %v63_v9 = vsel %vm27_vm0, %v61_v8, 0.0 }
  0x8d   :  { %64 = vadd.xlane.f32.xlu0 %v63_v9 }
  0x9a   :  { %86 = vrot.lane.b32.xlu1 %v107_v3, %s170_s21 }
  0xa3   :  { %54 = vrot.lane.b32.xlu0 %v107_v3, %s171_s22 }
  0xc6   :  { %v30_v10 = vpop.xlane.xlu1 %29 }
  0xc7   :  { %v31_v11 = vmul.f32 0.03125, %v30_v10 }
  0xc9   :  { %v32_v12 = vadd.f32 1e-06, %v31_v11 }
  0xca   :  { %v71_v16 = vpop.permute.xlu1 %70 }
  0xcb   :  { %113 = vrsqrt.f32 %v32_v12 }
  0xd5   :  { %v114_v13 = vpop.eup %113 }
  0xd6   :  { %v34_v14 = vmul.f32 %v114_v13, %v24_v0 }
  0xd8   :  { %v41_v15 = vmul.f32 %v107_v3, %v34_v14 }
  0xda   :  { %42 = vst.msk [vmem:[#allocation5] sm:$0xf] %vm27_vm0, %v41_v15 }
 0x116   :  { %v49_v17 = vpop.xlane.xlu0 %48  ;;  %v81_v18 = vpop.xlane.xlu1 %80 }
 0x117   :  { %v50_v19 = vmul.f32 0.03125, %v49_v17  ;;  %v82_v20 = vmul.f32 0.03125, %v81_v18 }
 0x119   :  { %v51_v21 = vadd.f32 1e-06, %v50_v19  ;;  %v83_v22 = vadd.f32 1e-06, %v82_v20 }
 0x11a   :  { %v65_v23 = vpop.xlane.xlu0 %64  ;;  %v87_v32 = vpop.permute.xlu1 %86 }
 0x11b   :  { %115 = vrsqrt.f32 %v51_v21  ;;  %v66_v24 = vmul.f32 0.03125, %v65_v23 }
 0x11c   :  { %117 = vrsqrt.f32 %v83_v22 }
 0x11d   :  { %v67_v25 = vadd.f32 1e-06, %v66_v24 }
 0x11e   :  { %v55_v27 = vpop.permute.xlu0 %54 }
 0x11f   :  { %119 = vrsqrt.f32 %v67_v25 }
 0x125   :  { %v116_v26 = vpop.eup %115 }
 0x126   :  { %v118_v28 = vpop.eup %117  ;;  %v53_v29 = vmul.f32 %v116_v26, %v24_v0 }
 0x127   :  { %v85_v30 = vmul.f32 %v118_v28, %v24_v0 }
 0x128   :  { %v57_v31 = vmul.f32 %v55_v27, %v53_v29 }
 0x129   :  { %v120_v33 = vpop.eup %119  ;;  %v89_v35 = vmul.f32 %v87_v32, %v85_v30 }
 0x12a   :  { %v69_v34 = vmul.f32 %v120_v33, %v24_v0  ;;  %59 = vst.msk [vmem:[#allocation5] sm:$0xf] %vm58_vm1, %v57_v31 }
 0x12c   :  { %v73_v36 = vmul.f32 %v71_v16, %v69_v34 }
 0x12e   :  { %75 = vst.msk [vmem:[#allocation5] sm:$0xf] %vm74_vm2, %v73_v36 }
 0x12f   :  { %91 = vst.msk [vmem:[#allocation5] sm:$0xf] %vm90_vm3, %v89_v35 }
 0x130   :  { %154 = shalt.err (!%p151_p12)
}
 0x131   :  { %s155_s29 = scalar_lea.hbm %s223_s2, 64 }
 0x132   :  { %p156_p13 = scmp.ne.s32.totalorder %s223_s2, %s155_s29  ;;  %p159_p0 = scmp.lt.u32.totalorder %s155_s29, %s223_s2 }
 0x134   :  { %p161_p1 = pnand %p159_p0, %p156_p13 }
 0x136   :  { %164 = shalt.err (!%p161_p1)
}
 0x137   :  { %101 = dma.vmem_to_hbm [thread:$0]  %s99_s1, 64, %s223_s2, [#allocation4]  }
 0x138   :  { %167 = dma.done.wait [#allocation4], 64  }
 0x139   :  { %168 = vsyncadd [#allocation4], 4294967232 }
 0x13a   :  { %105 = vsyncpa [#allocation3], 1 }
 0x13b   :  { %106 = vsyncpa [#allocation4], 1 }

</bundles_post_ra>
